<compile_context>
chip_gen: v6e
topology: v6e:2x2x1
jax: 0.10.0
libtpu: 0.0.40
codegen_flags: <defaults>
</compile_context>

<pallas_src>
import types

import jax
import jax.numpy as jnp
import numpy as np
from jax.experimental import pallas as pl
from jax.experimental.pallas import tpu as pltpu


# ---------------------------------------------------------------------------
# Generation-aware VMEM planning
# ---------------------------------------------------------------------------

def _round_up(x, m):
    return ((x + m - 1) // m) * m


def _divisors_desc(n):
    small, large = [], []
    d = 1
    while d * d <= n:
        if n % d == 0:
            small.append(d)
            if d != n // d:
                large.append(n // d)
        d += 1
    return sorted(small + large, reverse=True)


def _vmem_capacity_bytes():
    # 128 MiB on v5e/v6e, 64 MiB per TensorCore on v7x.
    try:
        info = pltpu.get_tpu_info()
        for attr in ("vmem_capacity_bytes", "vmem_size_bytes", "vmem_bytes"):
            v = getattr(info, attr, None)
            if v:
                return int(v)
    except Exception:
        pass
    return 64 * 1024 * 1024          # conservative (v7x-sized) fallback


def _vmem_plan():
    cap = _vmem_capacity_bytes()
    vmem_limit = (3 * cap) // 4       # 96 MiB on 128 MiB parts, 48 MiB on v7x
    vmem_limit = max(32 * 1024 * 1024, min(vmem_limit, 96 * 1024 * 1024))
    footprint_budget = cap // 4       # total pipelined footprint target
    return vmem_limit, footprint_budget


def _plan_bb_ts(B, S, footprint_fn, budget, allow_s_tiling=True):
    """Pick (batch rows per block BB, token tile TS) maximizing block size."""
    if allow_s_tiling:
        ts_cands = [S] + [d for d in _divisors_desc(S) if d % 128 == 0 and d != S]
    else:
        ts_cands = [S]
    best = None
    for TS in ts_cands:
        for BB in _divisors_desc(B):
            if footprint_fn(BB, TS) <= budget:
                cand = (BB * TS, TS, BB)
                if best is None or cand > best:
                    best = cand
                break                          # largest fitting BB for this TS
    if best is None:
        # Nothing fits the soft budget: smallest block, rely on vmem_limit headroom.
        # TODO(synk): add a two-level (D-tiled) fallback for extreme S*D.
        TS = min(ts_cands)
        BB = 1
    else:
        _, TS, BB = best
    # v7x has 2 TensorCores: keep >= 2 grid points on the "parallel" batch axis
    # whenever B allows it (negligible extra per-step cost on v5e/v6e).
    if B >= 2 and B // BB < 2:
        for cand in _divisors_desc(B):
            if cand < B:
                BB = cand
                break
    # TODO(synk): consider pipeline_mode=pl.Buffered(3) when the chosen block is
    # small and VMEM headroom allows a third buffer.
    return BB, TS


# ---------------------------------------------------------------------------
# Kernels  (mean/max grid = (B//BB, S//TS); weighted-mean grid = (B//BB,))
# ---------------------------------------------------------------------------

def _mean_vpu_kernel(emb_ref, w_ref, out_ref, acc_ref):
    # f32 path: emb (BB,TS,D) f32, w (BB,TS,1) f32 with 1/denominator folded in.
    s = pl.program_id(1)

    @pl.when(s == 0)
    def _():
        acc_ref[...] = jnp.zeros_like(acc_ref)

    acc_ref[...] += jnp.sum(emb_ref[...] * w_ref[...], axis=1, keepdims=True)

    @pl.when(s == pl.num_programs(1) - 1)
    def _():
        out_ref[...] = acc_ref[...].astype(out_ref.dtype)


def _mean_mxu_kernel(emb_ref, w_ref, out_ref, acc_ref):
    # bf16 path: emb (BB,TS,D) native, w (BB,1,TS) native (lane-dense, inv folded).
    # The S reduction runs on the MXU with f32 accumulation: no f32 upcast of the
    # embedding tile and no lane-1 weight block.
    s = pl.program_id(1)

    @pl.when(s == 0)
    def _():
        acc_ref[...] = jnp.zeros_like(acc_ref)

    acc_ref[...] += jnp.einsum('bks,bsd->bkd', w_ref[...], emb_ref[...],
                               preferred_element_type=jnp.float32)

    @pl.when(s == pl.num_programs(1) - 1)
    def _():
        out_ref[...] = acc_ref[...].astype(out_ref.dtype)


def _max_kernel(emb_ref, valid_ref, out_ref, acc_ref):
    # Masking and max stay in the embedding's native dtype (max only selects
    # existing values); only the tiny (BB,1,D) running max lives in f32.
    s = pl.program_id(1)

    @pl.when(s == 0)
    def _():
        acc_ref[...] = jnp.full_like(acc_ref, -jnp.inf)

    e = emb_ref[...]                                    # (BB,TS,D) native dtype
    masked = jnp.where(valid_ref[...] == 0.0, -1000000000.0, e)
    tile_max = jnp.max(masked, axis=1, keepdims=True).astype(jnp.float32)
    acc_ref[...] = jnp.maximum(acc_ref[...], tile_max)

    @pl.when(s == pl.num_programs(1) - 1)
    def _():
        out_ref[...] = acc_ref[...].astype(out_ref.dtype)


def _weighted_mean_mxu_kernel(emb_ref, t_ref, wn_ref, inv_ref, out_ref):
    # bf16 path: all three contractions run on the MXU with f32 accumulation;
    # the (BB,S,D) embedding tile is never materialized in f32.
    e = emb_ref[...]                                    # (BB,S,D) native
    t = t_ref[...]                                      # (BB,1,S) native, 0/1
    wn = wn_ref[...]                                    # (BB,1,S) f32, mask*(1-type)
    inv = inv_ref[...]                                  # (BB,1,1) f32
    seq_len = e.shape[1]
    # key-phrase embedding = mean over tokens of emb * token_type
    kpe = jnp.einsum('bks,bsd->bkd', t, e,
                     preferred_element_type=jnp.float32) * (1.0 / seq_len)  # (BB,1,D)
    # per-token score and (unmasked) softmax over tokens, as in the reference
    w_raw = jnp.einsum('bkd,bsd->bks', kpe.astype(e.dtype), e,
                       preferred_element_type=jnp.float32)                  # (BB,1,S)
    w_max = jnp.max(w_raw, axis=2, keepdims=True)
    w_exp = jnp.exp(w_raw - w_max)
    w = w_exp / jnp.sum(w_exp, axis=2, keepdims=True)
    ww = (w * wn).astype(e.dtype)                                           # (BB,1,S)
    pooled = jnp.einsum('bks,bsd->bkd', ww, e,
                        preferred_element_type=jnp.float32)                 # (BB,1,D)
    out_ref[...] = (pooled * inv).astype(out_ref.dtype)


def _weighted_mean_vpu_kernel(emb_ref, t_ref, wn_ref, inv_ref, out_ref):
    # f32 path: exact VPU arithmetic (matches the torch reference up to
    # reduction order); used only when embeddings are already f32.
    e = emb_ref[...].astype(jnp.float32)                # (BB,S,D)
    t = t_ref[...]                                      # (BB,S,1)
    wn = wn_ref[...]                                    # (BB,S,1)
    inv = inv_ref[...]                                  # (BB,1,1)
    kpe = jnp.mean(e * t, axis=1, keepdims=True)                            # (BB,1,D)
    w_raw = jnp.sum(e * kpe, axis=2, keepdims=True)                         # (BB,S,1)
    w_max = jnp.max(w_raw, axis=1, keepdims=True)
    w_exp = jnp.exp(w_raw - w_max)
    w = w_exp / jnp.sum(w_exp, axis=1, keepdims=True)
    pooled = jnp.sum(e * (w * wn), axis=1, keepdims=True)                   # (BB,1,D)
    out_ref[...] = (pooled * inv).astype(out_ref.dtype)


# ---------------------------------------------------------------------------
# pallas_call wrappers
# ---------------------------------------------------------------------------

def _mean_pool(emb, w, inv, out_dtype):
    """out[b, :] = sum_s emb[b, s, :] * w[b, s] * inv[b]  (w is 0/1 weights)."""
    B, S, D = emb.shape
    itemsize = jnp.dtype(emb.dtype).itemsize
    out_itemsize = jnp.dtype(out_dtype).itemsize
    vmem_limit, budget = _vmem_plan()
    d_pad = _round_up(D, 128)
    use_mxu = emb.dtype != jnp.float32

    if use_mxu:
        def footprint(BB, TS):
            emb_blk = BB * _round_up(TS, 8) * d_pad * itemsize
            w_blk = BB * 8 * _round_up(TS, 128) * itemsize     # lane-dense
            out_blk = BB * 8 * d_pad * out_itemsize
            acc = BB * 8 * d_pad * 4
            return 2 * (emb_blk + w_blk + out_blk) + acc
    else:
        def footprint(BB, TS):
            emb_blk = BB * _round_up(TS, 8) * d_pad * 4
            w_blk = BB * _round_up(TS, 8) * 128 * 4            # padded lane-1 block
            out_blk = BB * 8 * d_pad * out_itemsize
            acc = BB * 8 * d_pad * 4
            return 2 * (emb_blk + w_blk + out_blk) + acc

    BB, TS = _plan_bb_ts(B, S, footprint, budget)

    w_scaled = w * inv[:, None]                                # fold 1/denominator
    if use_mxu:
        w_arr = w_scaled.astype(emb.dtype).reshape(B, 1, S)
        w_spec = pl.BlockSpec((BB, 1, TS), lambda b, s: (b, 0, s))
        kernel = _mean_mxu_kernel
    else:
        w_arr = w_scaled.astype(jnp.float32).reshape(B, S, 1)
        w_spec = pl.BlockSpec((BB, TS, 1), lambda b, s: (b, s, 0))
        kernel = _mean_vpu_kernel

    out = pl.pallas_call(
        kernel,
        out_shape=jax.ShapeDtypeStruct((B, 1, D), out_dtype),
        grid_spec=pltpu.PrefetchScalarGridSpec(
            num_scalar_prefetch=0,
            grid=(B // BB, S // TS),
            in_specs=[pl.BlockSpec((BB, TS, D), lambda b, s: (b, s, 0)), w_spec],
            out_specs=pl.BlockSpec((BB, 1, D), lambda b, s: (b, 0, 0)),
            scratch_shapes=[pltpu.VMEM((BB, 1, D), jnp.float32)]),
        compiler_params=pltpu.CompilerParams(
            dimension_semantics=("parallel", "arbitrary"),
            vmem_limit_bytes=vmem_limit),
    )(emb, w_arr)
    return out.reshape(B, D)


def _max_pool(emb, valid):
    """Masked max over tokens; valid[b, s] == 0 means 'replace with -1e9'."""
    B, S, D = emb.shape
    itemsize = jnp.dtype(emb.dtype).itemsize
    vmem_limit, budget = _vmem_plan()
    d_pad = _round_up(D, 128)

    def footprint(BB, TS):
        emb_blk = BB * _round_up(TS, 8) * d_pad * itemsize
        v_blk = BB * _round_up(TS, 8) * 128 * 4                # padded lane-1 block
        out_blk = BB * 8 * d_pad * itemsize
        acc = BB * 8 * d_pad * 4
        return 2 * (emb_blk + v_blk + out_blk) + acc

    BB, TS = _plan_bb_ts(B, S, footprint, budget)
    valid_arr = valid.astype(jnp.float32).reshape(B, S, 1)

    out = pl.pallas_call(
        _max_kernel,
        out_shape=jax.ShapeDtypeStruct((B, 1, D), emb.dtype),
        grid_spec=pltpu.PrefetchScalarGridSpec(
            num_scalar_prefetch=0,
            grid=(B // BB, S // TS),
            in_specs=[pl.BlockSpec((BB, TS, D), lambda b, s: (b, s, 0)),
                      pl.BlockSpec((BB, TS, 1), lambda b, s: (b, s, 0))],
            out_specs=pl.BlockSpec((BB, 1, D), lambda b, s: (b, 0, 0)),
            scratch_shapes=[pltpu.VMEM((BB, 1, D), jnp.float32)]),
        compiler_params=pltpu.CompilerParams(
            dimension_semantics=("parallel", "arbitrary"),
            vmem_limit_bytes=vmem_limit),
    )(emb, valid_arr)
    return out.reshape(B, D)


def _weighted_mean_pool(emb, mask, ttyp, out_dtype):
    B, S, D = emb.shape
    itemsize = jnp.dtype(emb.dtype).itemsize
    vmem_limit, budget = _vmem_plan()
    d_pad = _round_up(D, 128)
    s_pad8 = _round_up(S, 8)
    s_pad128 = _round_up(S, 128)
    use_mxu = emb.dtype != jnp.float32

    wn = mask * (1.0 - ttyp)                                   # mask * (1 - type)
    inv = 1.0 / jnp.maximum(jnp.sum(mask * ttyp, axis=1), 1e-9)
    inv_arr = inv.astype(jnp.float32).reshape(B, 1, 1)

    if use_mxu:
        def footprint(BB, TS):
            emb_blk = BB * s_pad8 * d_pad * itemsize
            side = BB * 8 * s_pad128 * (itemsize + 4) + BB * 8 * 128 * 4
            temps = 3 * BB * 8 * s_pad128 * 4 + 2 * BB * 8 * d_pad * 4
            out_blk = BB * 8 * d_pad * 4
            return 2 * (emb_blk + side + out_blk) + temps
    else:
        def footprint(BB, TS):
            emb_blk = BB * s_pad8 * d_pad * 4
            side = 2 * BB * s_pad8 * 128 * 4 + BB * 8 * 128 * 4
            temps = 3 * emb_blk + 3 * BB * s_pad8 * 128 * 4    # f32 elementwise temps
            out_blk = BB * 8 * d_pad * 4
            return 2 * (emb_blk + side + out_blk) + temps

    BB, _ = _plan_bb_ts(B, S, footprint, budget, allow_s_tiling=False)

    if use_mxu:
        t_arr = ttyp.astype(emb.dtype).reshape(B, 1, S)
        wn_arr = wn.astype(jnp.float32).reshape(B, 1, S)
        t_spec = pl.BlockSpec((BB, 1, S), lambda b: (b, 0, 0))
        wn_spec = pl.BlockSpec((BB, 1, S), lambda b: (b, 0, 0))
        kernel = _weighted_mean_mxu_kernel
    else:
        t_arr = ttyp.astype(jnp.float32).reshape(B, S, 1)
        wn_arr = wn.astype(jnp.float32).reshape(B, S, 1)
        t_spec = pl.BlockSpec((BB, S, 1), lambda b: (b, 0, 0))
        wn_spec = pl.BlockSpec((BB, S, 1), lambda b: (b, 0, 0))
        kernel = _weighted_mean_vpu_kernel

    out = pl.pallas_call(
        kernel,
        out_shape=jax.ShapeDtypeStruct((B, 1, D), out_dtype),
        grid_spec=pltpu.PrefetchScalarGridSpec(
            num_scalar_prefetch=0,
            grid=(B // BB,),
            in_specs=[pl.BlockSpec((BB, S, D), lambda b: (b, 0, 0)),
                      t_spec, wn_spec,
                      pl.BlockSpec((BB, 1, 1), lambda b: (b, 0, 0))],
            out_specs=pl.BlockSpec((BB, 1, D), lambda b: (b, 0, 0))),
        compiler_params=pltpu.CompilerParams(
            dimension_semantics=("parallel",),
            vmem_limit_bytes=vmem_limit),
    )(emb, t_arr, wn_arr, inv_arr)
    return out.reshape(B, D)


# ---------------------------------------------------------------------------
# Pooling module (JAX/Pallas port of the PyTorch nn.Module)
# ---------------------------------------------------------------------------

class Pooling:
    def __init__(self, args, word_embedding_dimension: int):
        self.args = args
        self.word_embedding_dimension = word_embedding_dimension
        self.pooling_mode_cls_token = False
        self.pooling_mode_mean_tokens = False
        self.pooling_mode_max_tokens = False
        self.pooling_mode_mean_sqrt_len_tokens = False
        self.pooling_mode_weighted_mean_tokens = False
        if args.pooling == 'mean':
            self.pooling_mode_mean_tokens = True
        elif args.pooling == 'max':
            self.pooling_mode_max_tokens = True
        elif args.pooling == 'cls':
            if args.separate_phrase:
                self.pooling_mode_mean_tokens = True
            else:
                self.pooling_mode_cls_token = True
        elif args.pooling == 'meansqrt':
            self.pooling_mode_mean_sqrt_len_tokens = True
        elif args.pooling == 'weightedmean':
            self.pooling_mode_weighted_mean_tokens = True
        self.pooling_output_dimension = word_embedding_dimension

    def forward(self, features):
        token_embeddings = features['token_embeddings']
        cls_token = features['cls_token_embeddings']
        attention_mask = features['attention_mask']
        token_type = features['token_type_ids']

        B, S, _ = token_embeddings.shape
        mask = attention_mask.astype(jnp.float32)       # (B, S), tiny
        ttyp = token_type.astype(jnp.float32)           # (B, S), tiny
        sep = bool(self.args.separate_phrase)
        # torch promotes emb * mask.float() -> f32 for the mean/weighted paths
        f32_out = jnp.promote_types(token_embeddings.dtype, jnp.float32)

        if self.pooling_mode_cls_token:
            output_vector = cls_token                   # pure pass-through, no kernel

        elif self.pooling_mode_max_tokens:
            # TODO(synk): the PyTorch code also mutates features['token_embeddings']
            # in place with the -1e9 sentinel; only the pooled output is reproduced.
            valid = mask * (1.0 - ttyp) if sep else mask
            output_vector = _max_pool(token_embeddings, valid)

        elif self.pooling_mode_mean_tokens or self.pooling_mode_mean_sqrt_len_tokens:
            if sep:
                w = mask * (1.0 - ttyp)
                denom = jnp.sum(mask * ttyp, axis=1)    # reference's asymmetric norm
            else:
                w = mask
                denom = jnp.sum(mask, axis=1)
            if ('token_weights_sum' in features) and not sep:
                denom = features['token_weights_sum'].astype(jnp.float32)
            # TODO(synk): token_weights_sum combined with separate_phrase is not
            # wired (the reference's shape arithmetic for that branch is ambiguous).
            denom = jnp.maximum(denom, 1e-9)
            if self.pooling_mode_mean_sqrt_len_tokens:
                inv = 1.0 / jnp.sqrt(denom)
            else:
                inv = 1.0 / denom
            output_vector = _mean_pool(token_embeddings, w, inv, f32_out)

        elif self.pooling_mode_weighted_mean_tokens:
            output_vector = _weighted_mean_pool(token_embeddings, mask, ttyp, f32_out)

        else:
            raise ValueError("no pooling mode selected")

        features.update({'sentence_embedding': output_vector})
        return features

    def get_sentence_embedding_dimension(self):
        return self.pooling_output_dimension


# ---------------------------------------------------------------------------
# Pure-JAX references (for verification)
# ---------------------------------------------------------------------------

def _ref_weighted_mean(emb, mask, ttype):
    e = emb.astype(jnp.float32)
    m = mask.astype(jnp.float32)[..., None]
    t = ttype.astype(jnp.float32)[..., None]
    kpe = jnp.mean(e * t, axis=1)
    w_raw = jnp.einsum('bsd,bd->bs', e, kpe)
    w = jax.nn.softmax(w_raw, axis=1)[..., None]
    sum_emb = jnp.sum(e * w * m * (1.0 - t), axis=1)
    sum_mask = jnp.maximum(jnp.sum(m * t, axis=1), 1e-9)
    return sum_emb / sum_mask


def _ref_mean(emb, mask, ttype, separate_phrase, sqrt_len):
    e = emb.astype(jnp.float32)
    m = mask.astype(jnp.float32)[..., None]
    t = ttype.astype(jnp.float32)[..., None]
    if separate_phrase:
        sum_emb = jnp.sum(e * m * (1.0 - t), axis=1)
        sum_mask = jnp.sum(m * t, axis=1)
    else:
        sum_emb = jnp.sum(e * m, axis=1)
        sum_mask = jnp.sum(m, axis=1)
    sum_mask = jnp.maximum(sum_mask, 1e-9)
    return sum_emb / (jnp.sqrt(sum_mask) if sqrt_len else sum_mask)


def _ref_max(emb, mask, ttype, separate_phrase):
    e = emb.astype(jnp.float32)
    m = mask.astype(jnp.float32)[..., None]
    e = jnp.where(m == 0.0, -1000000000.0, e)
    if separate_phrase:
        t = ttype.astype(jnp.float32)[..., None]
        e = jnp.where(t == 1.0, -1000000000.0, e)
    return jnp.max(e, axis=1)


if __name__ == "__main__":
    B, S, D = 2, 16, 128
    key = jax.random.PRNGKey(0)
    token_embeddings = jax.random.normal(key, (B, S, D), dtype=jnp.float32)
    pos = jnp.arange(S)
    attention_mask = jnp.stack([(pos < 12), (pos < 16)]).astype(jnp.float32)
    token_type_ids = jnp.stack([((pos >= 2) & (pos <= 5)),
                                ((pos >= 1) & (pos <= 3))]).astype(jnp.int32)
    cls_token = token_embeddings[:, 0, :]

    features = {
        'token_embeddings': token_embeddings,
        'cls_token_embeddings': cls_token,
        'attention_mask': attention_mask,
        'token_type_ids': token_type_ids,
    }

    def run(pooling, separate_phrase, emb=None):
        args = types.SimpleNamespace(pooling=pooling, separate_phrase=separate_phrase)
        module = Pooling(args, word_embedding_dimension=D)
        f = dict(features)
        if emb is not None:
            f['token_embeddings'] = emb
            f['cls_token_embeddings'] = emb[:, 0, :]
        return jax.block_until_ready(module.forward(f)['sentence_embedding'])

    # ---- f32 paths (exact VPU arithmetic) -----------------------------------
    out = run('weightedmean', False)
    ref = _ref_weighted_mean(token_embeddings, attention_mask, token_type_ids)
    np.testing.assert_allclose(np.asarray(out), np.asarray(ref), rtol=1e-5, atol=1e-5)

    out = run('mean', False)
    ref = _ref_mean(token_embeddings, attention_mask, token_type_ids, False, False)
    np.testing.assert_allclose(np.asarray(out), np.asarray(ref), rtol=1e-5, atol=1e-5)

    out = run('mean', True)
    ref = _ref_mean(token_embeddings, attention_mask, token_type_ids, True, False)
    np.testing.assert_allclose(np.asarray(out), np.asarray(ref), rtol=1e-5, atol=1e-5)

    out = run('meansqrt', False)
    ref = _ref_mean(token_embeddings, attention_mask, token_type_ids, False, True)
    np.testing.assert_allclose(np.asarray(out), np.asarray(ref), rtol=1e-5, atol=1e-5)

    out = run('max', True)
    ref = _ref_max(token_embeddings, attention_mask, token_type_ids, True)
    np.testing.assert_allclose(np.asarray(out), np.asarray(ref), rtol=1e-5, atol=1e-5)

    out = run('cls', False)
    np.testing.assert_allclose(np.asarray(out), np.asarray(cls_token), rtol=0, atol=0)

    # ---- bf16 paths (MXU contractions, native-dtype max) --------------------
    emb_bf16 = token_embeddings.astype(jnp.bfloat16)

    out = run('mean', False, emb=emb_bf16)
    assert out.dtype == jnp.float32          # matches torch's f32 promotion
    ref = _ref_mean(emb_bf16, attention_mask, token_type_ids, False, False)
    np.testing.assert_allclose(np.asarray(out), np.asarray(ref), rtol=1e-2, atol=1e-2)

    out = run('weightedmean', False, emb=emb_bf16)
    assert out.dtype == jnp.float32
    ref = _ref_weighted_mean(emb_bf16, attention_mask, token_type_ids)
    np.testing.assert_allclose(np.asarray(out), np.asarray(ref), rtol=3e-2, atol=3e-2)

    out = run('max', True, emb=emb_bf16)
    assert out.dtype == jnp.bfloat16
    ref = _ref_max(emb_bf16, attention_mask, token_type_ids, True)
    np.testing.assert_allclose(np.asarray(out).astype(np.float32), np.asarray(ref),
                               rtol=1e-5, atol=1e-5)

    print("KERNEL_OK")
</pallas_src>

<mosaic_0001>
module attributes {stable_mosaic.version = 11 : i64} {
  func.func @_weighted_mean_vpu_kernel(%arg0: i32, %arg1: memref<1x16x128xf32, #tpu.memory_space<vmem>>, %arg2: memref<1x16x1xf32, #tpu.memory_space<vmem>>, %arg3: memref<1x16x1xf32, #tpu.memory_space<vmem>>, %arg4: memref<1x1x1xf32, #tpu.memory_space<vmem>>, %arg5: memref<1x1x128xf32, #tpu.memory_space<vmem>>) attributes {dimension_semantics = [#tpu.dimension_semantics<parallel>], iteration_bounds = array<i64: 2>, scalar_prefetch = 0 : i64, scratch_operands = 0 : i64, tpu.core_type = #tpu.core_type<tc>, window_params = [{transform_indices = @transform_0, window_bounds = array<i64: 1, 16, 128>}, {transform_indices = @transform_1, window_bounds = array<i64: 1, 16, 1>}, {transform_indices = @transform_2, window_bounds = array<i64: 1, 16, 1>}, {transform_indices = @transform_3, window_bounds = array<i64: 1, 1, 1>}, {transform_indices = @transform_4, window_bounds = array<i64: 1, 1, 128>}]} {
    %c0 = arith.constant 0 : index
    %c0_0 = arith.constant 0 : index
    %c0_1 = arith.constant 0 : index
    %0 = vector.load %arg1[%c0, %c0_0, %c0_1] : memref<1x16x128xf32, #tpu.memory_space<vmem>>, vector<1x16x128xf32>
    %c0_2 = arith.constant 0 : index
    %c0_3 = arith.constant 0 : index
    %c0_4 = arith.constant 0 : index
    %1 = vector.load %arg2[%c0_2, %c0_3, %c0_4] : memref<1x16x1xf32, #tpu.memory_space<vmem>>, vector<1x16x1xf32>
    %c0_5 = arith.constant 0 : index
    %c0_6 = arith.constant 0 : index
    %c0_7 = arith.constant 0 : index
    %2 = vector.load %arg3[%c0_5, %c0_6, %c0_7] : memref<1x16x1xf32, #tpu.memory_space<vmem>>, vector<1x16x1xf32>
    %c0_8 = arith.constant 0 : index
    %c0_9 = arith.constant 0 : index
    %c0_10 = arith.constant 0 : index
    %3 = vector.load %arg4[%c0_8, %c0_9, %c0_10] : memref<1x1x1xf32, #tpu.memory_space<vmem>>, vector<1x1x1xf32>
    %4 = vector.broadcast %1 : vector<1x16x1xf32> to vector<1x16x128xf32>
    %5 = arith.mulf %0, %4 : vector<1x16x128xf32>
    %cst = arith.constant dense<0.000000e+00> : vector<1x128xf32>
    %6 = vector.multi_reduction <add>, %5, %cst [1] : vector<1x16x128xf32> to vector<1x128xf32>
    %7 = vector.shape_cast %6 : vector<1x128xf32> to vector<1x1x128xf32>
    %cst_11 = arith.constant 1.600000e+01 : f32
    %8 = vector.broadcast %cst_11 : f32 to vector<1x1x128xf32>
    %9 = arith.divf %7, %8 : vector<1x1x128xf32>
    %10 = vector.broadcast %9 : vector<1x1x128xf32> to vector<1x16x128xf32>
    %11 = arith.mulf %0, %10 : vector<1x16x128xf32>
    %cst_12 = arith.constant dense<0.000000e+00> : vector<1x16xf32>
    %12 = vector.multi_reduction <add>, %11, %cst_12 [2] : vector<1x16x128xf32> to vector<1x16xf32>
    %13 = vector.shape_cast %12 : vector<1x16xf32> to vector<1x16x1xf32>
    %cst_13 = arith.constant dense<0xFF800000> : vector<1x1xf32>
    %14 = vector.multi_reduction <maximumf>, %13, %cst_13 [1] : vector<1x16x1xf32> to vector<1x1xf32>
    %15 = vector.shape_cast %14 : vector<1x1xf32> to vector<1x1x1xf32>
    %16 = vector.broadcast %15 : vector<1x1x1xf32> to vector<1x16x1xf32>
    %17 = arith.subf %13, %16 : vector<1x16x1xf32>
    %18 = math.exp %17 : vector<1x16x1xf32>
    %cst_14 = arith.constant dense<0.000000e+00> : vector<1x1xf32>
    %19 = vector.multi_reduction <add>, %18, %cst_14 [1] : vector<1x16x1xf32> to vector<1x1xf32>
    %20 = vector.shape_cast %19 : vector<1x1xf32> to vector<1x1x1xf32>
    %21 = vector.broadcast %20 : vector<1x1x1xf32> to vector<1x16x1xf32>
    %22 = arith.divf %18, %21 : vector<1x16x1xf32>
    %23 = arith.mulf %22, %2 : vector<1x16x1xf32>
    %24 = vector.broadcast %23 : vector<1x16x1xf32> to vector<1x16x128xf32>
    %25 = arith.mulf %0, %24 : vector<1x16x128xf32>
    %cst_15 = arith.constant dense<0.000000e+00> : vector<1x128xf32>
    %26 = vector.multi_reduction <add>, %25, %cst_15 [1] : vector<1x16x128xf32> to vector<1x128xf32>
    %27 = vector.shape_cast %26 : vector<1x128xf32> to vector<1x1x128xf32>
    %28 = vector.broadcast %3 : vector<1x1x1xf32> to vector<1x1x128xf32>
    %29 = arith.mulf %27, %28 : vector<1x1x128xf32>
    %c0_16 = arith.constant 0 : index
    %c0_17 = arith.constant 0 : index
    %c0_18 = arith.constant 0 : index
    %30 = vector.load %arg5[%c0_16, %c0_17, %c0_18] : memref<1x1x128xf32, #tpu.memory_space<vmem>>, vector<1x1x128xf32>
    tpu.vector_store %arg5[%c0_16, %c0_17, %c0_18], %29 {strides = array<i32>} : memref<1x1x128xf32, #tpu.memory_space<vmem>>, vector<1x1x128xf32>,
    return
  }
  func.func @transform_0(%arg0: i32) -> (i32, i32, i32) {
    %c0_i32 = arith.constant 0 : i32
    %c0_i32_0 = arith.constant 0 : i32
    %c0_i32_1 = arith.constant 0 : i32
    return %arg0, %c0_i32, %c0_i32_0 : i32, i32, i32
  }
  func.func @transform_1(%arg0: i32) -> (i32, i32, i32) {
    %c0_i32 = arith.constant 0 : i32
    %c0_i32_0 = arith.constant 0 : i32
    %c0_i32_1 = arith.constant 0 : i32
    return %arg0, %c0_i32, %c0_i32_0 : i32, i32, i32
  }
  func.func @transform_2(%arg0: i32) -> (i32, i32, i32) {
    %c0_i32 = arith.constant 0 : i32
    %c0_i32_0 = arith.constant 0 : i32
    %c0_i32_1 = arith.constant 0 : i32
    return %arg0, %c0_i32, %c0_i32_0 : i32, i32, i32
  }
  func.func @transform_3(%arg0: i32) -> (i32, i32, i32) {
    %c0_i32 = arith.constant 0 : i32
    %c0_i32_0 = arith.constant 0 : i32
    %c0_i32_1 = arith.constant 0 : i32
    return %arg0, %c0_i32, %c0_i32_0 : i32, i32, i32
  }
  func.func @transform_4(%arg0: i32) -> (i32, i32, i32) {
    %c0_i32 = arith.constant 0 : i32
    %c0_i32_0 = arith.constant 0 : i32
    %c0_i32_1 = arith.constant 0 : i32
    return %arg0, %c0_i32, %c0_i32_0 : i32, i32, i32
  }
}

</mosaic_0001>

<bundles_post_ra>
// kernel: tpu_custom_call.1
= control target key start
LH: loop header
LB: loop body
LE: loop exit
PB: predicated region body
PF: predicated region fallthrough
CT: control target
= control target key end

     0   :  { %9 = vsyncpa [#allocation3], 0  ;;  %s697_s0 = inlined_call_operand.vmem [shape: f32[2,16,128], index: 0, kind: input, shape index: {}]   ;;  %s698_s1 = inlined_call_operand.vmem [shape: f32[2,16,1], index: 1, kind: input, shape index: {}]   ;;  %s699_s2 = inlined_call_operand.vmem [shape: f32[2,16,1], index: 2, kind: input, shape index: {}]   ;;  %s700_s3 = inlined_call_operand.vmem [shape: f32[2,1,1], index: 3, kind: input, shape index: {}]   ;;  %s701_s4 = inlined_call_operand.hbm [shape: f32[2,1,128], index: 4, kind: output, shape index: {}]  }
   0x1   :  { %11 = vsyncpa [#allocation3 + $0x1], 0  ;;  %s592_s15 = smov 0   ;;  %s594_s16 = smov 0  }
   0x2   :  { %s596_s17 = smov 0   ;;  %s598_s18 = smov 0  }
   0x3 LB: > { %s613_s19 = sadd.s32 4294967295, %s563_s18   ;;  %s439_s20 = sadd.s32 4294967294, %s563_s18   ;;  %s563_s18 = sphi %s598_s18, %s707_s18   ;;  %s559_s17 = sphi %s596_s17, %s706_s17   ;;  %s555_s16 = sphi %s594_s16, %s705_s16   ;;  %s551_s15 = sphi %s592_s15, %s704_s15  }
   0x4   : > { %s617_s21 = sadd.s32 1, %s563_s18   ;;  %s128_s22 = sadd.s32 1, %s559_s17 }
   0x5   : > { %s125_s23 = ssub.s32 %s563_s18, %s617_s21  ;;  %p138_p0 = scmp.ne.s32.totalorder %s559_s17, %s555_s16 }
   0x6   : > { %p126_p1 = scmp.eq.s32.totalorder %s125_s23, 0  ;;  %p139_p2 = scmp.eq.s32.totalorder %s613_s19, 1 }
   0x7   : > { %p144_p3 = scmp.ne.s32.totalorder %s555_s16, %s551_s15  ;;  %p145_p4 = scmp.eq.s32.totalorder %s439_s20, 1 }
   0x8   : > { %s628_s24 = scalar_select %p126_p1, %s559_s17, %s128_s22  }
   0x9   : > { %p630_p5 = por %p139_p2, %p138_p0  ;;  %p634_p6 = por %p145_p4, %p144_p3 }
   0xa   : > { %p442_p7 = scmp.ge.s32.totalorder %s563_s18, 1  ;;  %p193_p8 = scmp.lt.s32.totalorder %s563_s18, 3 }
   0xc   : > { %p194_p9 = pnand %p442_p7, %p193_p8 }
   0xd   : > { %p231_p10 = scmp.lt.s32.totalorder (!%p194_p9), %s613_s19, 1  ;;  %s229_s20 = sand.u32 (!%p194_p9), 1, %s555_s16  }
   0xe   : > { %197 = sbr.rel (%p194_p9) target bundleno = 534 (0x216), region = 36  ;;  %s449_s22 = sshll.u32 (!%p194_p9), %s613_s19, 4 }
   0xf   : > { %s230_s23 = scalar_lea.vmem (!%p194_p9), [#allocation2], %s229_s20  ;;  %s349_s30 = scalar_lea.hbm (!%p194_p9), %s701_s4, %s449_s22 }
  0x10   : > { %s566_s7 = smov (!%p194_p9), [#allocation2]  }
  0x13   : > { %v565_v0 = vmov 0   ;;  %s642_s27 = scalar_select %p231_p10, %s613_s19, 1  ;;  %v332_v54 = vlaneseq }
  0x14   : > { %495 = vset.pattern.permute.xlu0 %v565_v0  ;;  %496 = vset.pattern.permute.xlu1 %v565_v0 }
  0x15   : > { %s645_s28 = sshll.u32 %s642_s27, 4  ;;  %s248_s14 = scalar_lea.vmem %s700_s3, %s642_s27  ;;  %v333_v57 = vshrl.u32 %v332_v54, 7 }
  0x16   : > { %s240_s5 = scalar_lea.vmem %s698_s1, %s645_s28  ;;  %s235_s8 = scalar_lea.vmem %s697_s0, %s645_s28  ;;  %v255_v48 = vld [vmem:[%s248_s14] sm:$0x1] }
  0x17   : > { %v251_v1 = vld [vmem:[%s240_s5] sm:$0xff]  ;;  %v252_v2 = vld [vmem:[%s240_s5 + $0x8] sm:$0xff]  ;;  %s245_s11 = scalar_lea.vmem %s699_s2, %s645_s28  ;;  %v334_v60 = vsub.s32 0, %v333_v57  ;;  %s351_s27 = sshll.u32 %s230_s23, 4  ;;  %s352_s27 = int_to_ptr.vmem [resolvable:$true] %s351_s27 }
  0x18   : > { %258 = vperm.xlu0 %495, %v251_v1   ;;  %v249_v4 = vld [vmem:[%s235_s8] sm:$0xff]  ;;  %v250_v5 = vld [vmem:[%s235_s8 + $0x8] sm:$0xff]  ;;  %s339_s5 = scalar_lea.sflag [#allocation3], %s229_s20  ;;  %s503_s6 = scalar_lea.vmem %s352_s27, 16 }
  0x19   : > { %v254_v42 = vld [vmem:[%s245_s11 + $0x8] sm:$0xff]  ;;  %v253_v43 = vld [vmem:[%s245_s11] sm:$0xff]  ;;  %p504_p11 = scmp.ne.s32.totalorder %s352_s27, %s503_s6  ;;  %s507_s8 = sshll.u32 %s566_s7, 4  ;;  %s508_s8 = int_to_ptr.vmem [resolvable:$false] %s507_s8 }
  0x1a   : > { %s509_s19 = scalar_lea.vmem %s508_s8, 32  ;;  %p510_p0 = scmp.lt.s32.totalorder %s352_s27, %s508_s8 }
  0x1b   : > { %p505_p12 = pnand %p504_p11, %p630_p5  ;;  %p511_p1 = scmp.lt.s32.totalorder %s509_s19, %s503_s6 }
  0x1c   : > { %263 = vperm.xlu0 %495, %v252_v2  }
  0x1d   : > { %p506_p13 = pneg %p505_p12  ;;  %p512_p2 = por %p511_p1, %p510_p0 }
  0x1f   : > { %p513_p3 = pnand %p512_p2, %p506_p13 }
  0x93   : > { %v259_v3 = vpop.permute.xlu0 %258 }
  0x94   : > { %v266_v7 = vmul.f32 %v259_v3, %v249_v4 }
  0x97   : > { %v264_v6 = vpop.permute.xlu0 %263 }
  0x98   : > { %v267_v8 = vmul.f32 %v264_v6, %v250_v5 }
  0x9a   : > { %v268_v9 = vadd.f32 %v267_v8, %v266_v7 }
  0x9c   : > { %v269_v10 = vrot.slane %v268_v9, 4 }
  0x9e   : > { %v270_v11 = vadd.f32 %v269_v10, %v268_v9 }
  0xa0   : > { %v271_v12 = vrot.slane %v270_v11, 2 }
  0xa2   : > { %v272_v13 = vadd.f32 %v271_v12, %v270_v11 }
  0xa4   : > { %v273_v14 = vrot.slane %v272_v13, 1 }
  0xa6   : > { %v274_v15 = vadd.f32 %v273_v14, %v272_v13 }
  0xa8   : > { %v276_v16 = vmul.f32 0.0625, %v274_v15 }
  0xaa   : > { %v277_v17 = vmul.f32 %v276_v16, %v249_v4  ;;  %v278_v18 = vmul.f32 %v276_v16, %v250_v5 }
  0xac   : > { %279 = vadd.xlane.f32.xlu1 %v277_v17 }
  0xb0   : > { %281 = vadd.xlane.f32.xlu1 %v278_v18 }
 0x135   : > { %v280_v19 = vpop.xlane.xlu1 %279 }
 0x139   : > { %v282_v20 = vpop.xlane.xlu1 %281 }
 0x13a   : > { %v283_v21 = vmax.f32 %v280_v19, %v282_v20 }
 0x13c   : > { %v284_v22 = vrot.slane %v283_v21, 4 }
 0x13e   : > { %v285_v23 = vmax.f32 %v283_v21, %v284_v22 }
 0x140   : > { %v286_v24 = vrot.slane %v285_v23, 2 }
 0x142   : > { %v287_v25 = vmax.f32 %v285_v23, %v286_v24 }
 0x144   : > { %v288_v26 = vrot.slane %v287_v25, 1 }
 0x146   : > { %v289_v27 = vmax.f32 %v287_v25, %v288_v26 }
 0x148   : > { %v290_v28 = vsub.f32 %v280_v19, %v289_v27  ;;  %v291_v29 = vsub.f32 %v282_v20, %v289_v27 }
 0x14a   : > { %v292_v30 = vmul.f32 1.442695, %v290_v28  ;;  %v294_v31 = vmul.f32 1.442695, %v291_v29 }
 0x14c   : > { %497 = vpow2.f32 %v292_v30 }
 0x14d   : > { %499 = vpow2.f32 %v294_v31 }
 0x159   : > { %v498_v32 = vpop.eup %497 }
 0x15a   : > { %v500_v33 = vpop.eup %499 }
 0x15b   : > { %v296_v34 = vadd.f32 %v500_v33, %v498_v32 }
 0x15d   : > { %v297_v35 = vrot.slane %v296_v34, 4 }
 0x15f   : > { %v298_v36 = vadd.f32 %v297_v35, %v296_v34 }
 0x161   : > { %v299_v37 = vrot.slane %v298_v36, 2 }
 0x163   : > { %v300_v38 = vadd.f32 %v299_v37, %v298_v36 }
 0x165   : > { %v301_v39 = vrot.slane %v300_v38, 1 }
 0x167   : > { %v302_v40 = vadd.f32 %v301_v39, %v300_v38 }
 0x169   : > { %501 = vrcp.f32 %v302_v40 }
 0x176   : > { %v502_v41 = vpop.eup %501 }
 0x177   : > { %v305_v44 = vmul.f32 %v502_v41, %v500_v33  ;;  %v304_v45 = vmul.f32 %v502_v41, %v498_v32 }
 0x179   : > { %v307_v46 = vmul.f32 %v305_v44, %v254_v42  ;;  %v306_v47 = vmul.f32 %v304_v45, %v253_v43 }
 0x17b   : > { %315 = vperm.xlu1 %496, %v307_v46   ;;  %310 = vperm.xlu0 %495, %v306_v47  }
 0x17f   : > { %329 = vperm.xlu0 %495, %v255_v48  }
 0x1f6   : > { %v316_v49 = vpop.permute.xlu1 %315  ;;  %v311_v50 = vpop.permute.xlu0 %310 }
 0x1f7   : > { %v319_v51 = vmul.f32 %v316_v49, %v250_v5  ;;  %v318_v52 = vmul.f32 %v311_v50, %v249_v4 }
 0x1f9   : > { %v320_v53 = vadd.f32 %v319_v51, %v318_v52 }
 0x1fa   : > { %v330_v61 = vpop.permute.xlu0 %329 }
 0x1fb   : > { %v321_v55 = vrot.slane %v320_v53, 4  ;;  %v335_v0 = vrot.slane %v330_v61, %v334_v60 }
 0x1fd   : > { %v322_v56 = vadd.f32 %v321_v55, %v320_v53 }
 0x1ff   : > { %v323_v58 = vrot.slane %v322_v56, 2 }
 0x201   : > { %v324_v59 = vadd.f32 %v323_v58, %v322_v56 }
 0x203   : > { %v325_v62 = vrot.slane %v324_v59, 1 }
 0x205   : > { %v326_v63 = vadd.f32 %v325_v62, %v324_v59 }
 0x207   : > { %v336_v1 = vmul.f32 %v335_v0, %v326_v63 }
 0x209   : > { %337 = vst [vmem:[%s230_s23] sm:$0x1] %v336_v1 }
 0x20a   : > { %516 = shalt.err (!%p513_p3)
}
 0x20b   : > { %s517_s9 = scalar_lea.hbm %s349_s30, 16  ;;  %s521_s12 = scalar_lea.hbm %s701_s4, 32 }
 0x20c   : > { %p518_p4 = scmp.ne.s32.totalorder %s349_s30, %s517_s9  ;;  %p522_p9 = scmp.lt.s32.totalorder %s349_s30, %s701_s4 }
 0x20d   : > { %p523_p10 = scmp.lt.s32.totalorder %s521_s12, %s517_s9 }
 0x20e   : > { %p519_p7 = pnand %p518_p4, %p630_p5 }
 0x20f   : > { %p524_p11 = por %p523_p10, %p522_p9 }
 0x210   : > { %p520_p8 = pneg %p519_p7 }
 0x212   : > { %p525_p12 = pnand %p524_p11, %p520_p8 }
 0x214   : > { %528 = shalt.err (!%p525_p12)
}
 0x215   : > { %455 = dma.vmem_to_hbm [thread:$0]  (%p630_p5), %s352_s27, 16, %s349_s30, %s339_s5  }
 0x216 PF: > { %p461_p13 = scmp.ge.s32.totalorder %s563_s18, 2  ;;  %s363_s20 = sand.u32 1, %s551_s15  }
 0x217   : > { %s364_s22 = scalar_lea.sflag [#allocation3], %s363_s20 }
 0x218   : > { %p458_p0 = pnand %p461_p13, %p634_p6 }
 0x21a   : > { %p459_p1 = pneg %p458_p0 }
 0x21c   : > { %546 = dma.done.wait (%p459_p1), %s364_s22, 16  }
 0x21d   : > { %548 = vsyncadd (%p459_p1), %s364_s22, 4294967280  ;;  %p14_p2 = scmp.ge.s32.totalorder %s617_s21, 4   ;;  %s704_s15 = smov %s555_s16 }
 0x21e   : > { %s705_s16 = smov %s559_s17  ;;  %s706_s17 = smov %s628_s24 }
 0x21f   : > { %s707_s18 = smov %s617_s21  ;;  %16 = sbr.rel (!%p14_p2) target bundleno = 3 (0x3), region = 80 }
 0x224   :  { %368 = vsyncpa [#allocation3], 1 }
 0x225   :  { %370 = vsyncpa [#allocation3 + $0x1], 1 }

</bundles_post_ra>
